<compile_context>
chip_gen: v5e
topology: v5e:2x2
jax: 0.10.0
libtpu: 0.0.40
codegen_flags: <defaults>
</compile_context>

<pallas_src>
import functools

import jax
import jax.numpy as jnp
import numpy as np
from jax.experimental import pallas as pl
from jax.experimental.pallas import tpu as pltpu


# ----------------------------- Pallas kernels ------------------------------ #
def conv_relu_proj_kernel(pf_ref, pr_ref, wc_ref, bc_ref, wihf_ref, wihr_ref,
                          blstm_ref, z_ref):
    # pf_ref/pr_ref: (TILE_M, Cin*K) bf16 im2col patches (forward / revcomp path)
    # wc_ref:        (Cin*K, C)      bf16 shared Conv1d weight (both paths)
    # bc_ref:        (1, C)          f32 conv bias
    # wihf_ref:      (C, 4H)         bf16 LSTM input projection, forward-feature rows
    # wihr_ref:      (C, 4H)         bf16 LSTM input projection, revcomp-feature rows
    # blstm_ref:     (1, 4H)         f32 b_ih + b_hh, fused gates i|f|g|o
    # z_ref:         (TILE_M, 4H)    bf16 lane-dense pre-activations x_t @ Wih + b
    f_fwd = jnp.maximum(
        jnp.dot(pf_ref[...], wc_ref[...], preferred_element_type=jnp.float32)
        + bc_ref[...], 0.0)
    f_rc = jnp.maximum(
        jnp.dot(pr_ref[...], wc_ref[...], preferred_element_type=jnp.float32)
        + bc_ref[...], 0.0)
    # No lane-axis concat: two accumulating matmuls into the same f32 result.
    z = (jnp.dot(f_fwd.astype(wihf_ref.dtype), wihf_ref[...],
                 preferred_element_type=jnp.float32)
         + jnp.dot(f_rc.astype(wihr_ref.dtype), wihr_ref[...],
                   preferred_element_type=jnp.float32)
         + blstm_ref[...])
    z_ref[...] = z.astype(z_ref.dtype)
    # TODO(synk): for very long genomic L, replace host-side im2col with in-kernel
    # windowing (halo DMA + K shifted matmuls) to cut HBM input traffic by ~K x.


def lstm_dense_kernel(z_ref, whh_ref, wd_ref, bd_ref, o_ref, h_sc, c_sc, *,
                      seq_len, t_chunk, mask_tail, unroll):
    # z_ref:  (T_CHUNK, B_TILE, 4H) bf16 precomputed input projections, this chunk
    # whh_ref:(H, 4H) f32 fused recurrent weight;  wd_ref:(H, O);  bd_ref:(1, O)
    # o_ref:  (B_TILE, O) written only on the last time chunk
    # h_sc/c_sc: (B_TILE, H) f32 VMEM scratch carried across time-chunk grid steps
    @pl.when(pl.program_id(1) == 0)
    def _():
        h_sc[...] = jnp.zeros_like(h_sc)
        c_sc[...] = jnp.zeros_like(c_sc)

    H = h_sc.shape[-1]
    if mask_tail:
        t0 = pl.program_id(1) * t_chunk

    def step(t, carry):
        h, c = carry
        # Single fused-gate matmul per step: (B_TILE, H) @ (H, 4H).
        gates = (z_ref[t].astype(jnp.float32)
                 + jnp.dot(h, whh_ref[...], preferred_element_type=jnp.float32))
        # PyTorch gate order i | f | g | o along the fused 4H axis.
        # TODO(synk): at production sizes keep H a multiple of 128 so these slices
        # are whole-vreg views instead of lane selects on the critical path.
        i = jax.nn.sigmoid(gates[:, 0 * H:1 * H])
        f = jax.nn.sigmoid(gates[:, 1 * H:2 * H])
        g = jnp.tanh(gates[:, 2 * H:3 * H])
        o = jax.nn.sigmoid(gates[:, 3 * H:4 * H])
        c_new = f * c + i * g
        h_new = o * jnp.tanh(c_new)
        if mask_tail:
            valid = (t0 + t) < seq_len
            h_new = jnp.where(valid, h_new, h)
            c_new = jnp.where(valid, c_new, c)
        return (h_new, c_new)

    # h/c live in vregs across the chunk; VMEM scratch is touched once per chunk.
    h_fin, c_fin = jax.lax.fori_loop(0, t_chunk, step,
                                     (h_sc[...], c_sc[...]), unroll=unroll)
    h_sc[...] = h_fin
    c_sc[...] = c_fin

    # TODO(synk): optionally pin Whh in the MXU (pltpu.matmul_push_rhs once per
    # chunk + matmul_acc_lhs per step) to drop the per-step RHS push latency.

    # DenseBlock on the final hidden state (== out[:, -1, :] of a batch_first LSTM)
    @pl.when(pl.program_id(1) == pl.num_programs(1) - 1)
    def _():
        o_ref[...] = (jnp.dot(h_fin, wd_ref[...], preferred_element_type=jnp.float32)
                      + bd_ref[...]).astype(o_ref.dtype)


# ------------------------------ wrappers ----------------------------------- #
def _im2col(x_ncl, K):
    """x: (B, Cin, L) -> patches (Lc*B, Cin*K), rows ordered time-major (t*B + b)."""
    B, Cin, L = x_ncl.shape
    Lc = L - K + 1
    taps = [x_ncl[:, :, k:k + Lc] for k in range(K)]          # K x (B, Cin, Lc)
    p = jnp.stack(taps, axis=-1)                              # (B, Cin, Lc, K)
    p = p.transpose(2, 0, 1, 3)                               # (Lc, B, Cin, K)
    return p.reshape(Lc * B, Cin * K)


def _pick_tile_m(M, requested, align=16):
    """Largest multiple of `align` that divides M and is <= requested; falls back
    to the plain aligned clamp (which triggers the padded slow path)."""
    req = max(align, min(requested, M))
    req = (req // align) * align
    for t in range(req, align - 1, -align):
        if M % t == 0:
            return t
    return req


def ds_hybrid_forward(x, params, *, tile_m=512, t_chunk=128, b_tile=8,
                      unroll=8, vmem_limit_bytes=48 * 1024 * 1024):
    """Full dsHybrid forward (aggr='concat_cnn'). x: (B, 4, L) one-hot NCL.

    vmem_limit_bytes default (48 MiB) is safe on all generations; raise it (and
    tile_m / t_chunk) on v5e/v6e (128 MiB VMEM), keep headroom under v7x's 64 MiB.
    """
    wc, bc, wih, whh, blstm, wd, bd = params
    B, Cin, L = x.shape
    C, _, K = wc.shape
    Lc = L - K + 1
    H = whh.shape[0]
    G = 4 * H                                                 # fused gate width
    O = wd.shape[-1]

    # RevComp (flip channels + length); build bf16 patches for both paths.
    x_bf = x.astype(jnp.bfloat16)
    x_rc = jnp.flip(x_bf, axis=(1, 2))
    p_fwd = _im2col(x_bf, K)                                  # (Lc*B, Cin*K) bf16
    p_rc = _im2col(x_rc, K)

    M = Lc * B
    tile_m = _pick_tile_m(M, tile_m)
    pad = pl.cdiv(M, tile_m) * tile_m - M                     # 0 in the tuned case
    if pad:
        p_fwd = jnp.pad(p_fwd, ((0, pad), (0, 0)))
        p_rc = jnp.pad(p_rc, ((0, pad), (0, 0)))
    Mp = M + pad

    # bf16 operands for the MXU (f32 accumulation); split Wih by feature source.
    wc_mat = wc.reshape(C, Cin * K).T.astype(jnp.bfloat16)    # (Cin*K, C)
    wih_f = wih[:C].astype(jnp.bfloat16)                      # (C, 4H) forward feats
    wih_r = wih[C:].astype(jnp.bfloat16)                      # (C, 4H) revcomp feats
    bc2 = bc.reshape(1, C).astype(jnp.float32)
    blstm2 = blstm.reshape(1, G).astype(jnp.float32)

    # Fused conv + ReLU + LSTM input projection, tiled over M (parallel axis).
    z = pl.pallas_call(
        conv_relu_proj_kernel,
        out_shape=jax.ShapeDtypeStruct((Mp, G), jnp.bfloat16),
        grid_spec=pltpu.PrefetchScalarGridSpec(
            num_scalar_prefetch=0,
            grid=(Mp // tile_m,),
            in_specs=[
                pl.BlockSpec((tile_m, Cin * K), lambda m: (m, 0)),
                pl.BlockSpec((tile_m, Cin * K), lambda m: (m, 0)),
                pl.BlockSpec((Cin * K, C), lambda m: (0, 0)),
                pl.BlockSpec((1, C), lambda m: (0, 0)),
                pl.BlockSpec((C, G), lambda m: (0, 0)),
                pl.BlockSpec((C, G), lambda m: (0, 0)),
                pl.BlockSpec((1, G), lambda m: (0, 0)),
            ],
            out_specs=pl.BlockSpec((tile_m, G), lambda m: (m, 0)),
        ),
        compiler_params=pltpu.CompilerParams(
            dimension_semantics=("parallel",),            # v7x: shard across 2 TCs
            vmem_limit_bytes=vmem_limit_bytes),
    )(p_fwd, p_rc, wc_mat, bc2, wih_f, wih_r, blstm2)

    if pad:
        # TODO(synk): fallback path only — forces an HBM copy of z; the tuned path
        # picks tile_m dividing Lc*B so this never triggers.
        z = z[:M]
    z = z.reshape(Lc, B, G)          # free row-major split when pad == 0

    # Batch / time tiling for the recurrence.
    b_tile = min(b_tile, B)
    if B % b_tile != 0 or b_tile % 8 != 0:
        b_tile = B
    t_chunk = min(t_chunk, Lc)
    nt = pl.cdiv(Lc, t_chunk)
    mask_tail = (Lc % t_chunk) != 0
    unroll = max(1, min(unroll, t_chunk))

    kern = functools.partial(lstm_dense_kernel, seq_len=Lc, t_chunk=t_chunk,
                             mask_tail=mask_tail, unroll=unroll)
    out = pl.pallas_call(
        kern,
        out_shape=jax.ShapeDtypeStruct((B, O), jnp.float32),
        grid_spec=pltpu.PrefetchScalarGridSpec(
            num_scalar_prefetch=0,
            grid=(B // b_tile, nt),
            in_specs=[
                pl.BlockSpec((t_chunk, b_tile, G), lambda b, t: (t, b, 0)),
                pl.BlockSpec((H, G), lambda b, t: (0, 0)),
                pl.BlockSpec((H, O), lambda b, t: (0, 0)),
                pl.BlockSpec((1, O), lambda b, t: (0, 0)),
            ],
            out_specs=pl.BlockSpec((b_tile, O), lambda b, t: (b, 0)),
            scratch_shapes=[pltpu.VMEM((b_tile, H), jnp.float32),
                            pltpu.VMEM((b_tile, H), jnp.float32)],
        ),
        compiler_params=pltpu.CompilerParams(
            # batch tiles parallel (v7x megacore), time chunks serial recurrence
            dimension_semantics=("parallel", "arbitrary"),
            vmem_limit_bytes=vmem_limit_bytes),
    )(z, whh, wd, bd)
    return out


# ----------------------------- pure-JAX reference --------------------------- #
def ref_forward(x, params):
    wc, bc, wih, whh, blstm, wd, bd = params
    B, Cin, L = x.shape
    C, _, K = wc.shape
    Lc = L - K + 1
    H = whh.shape[0]

    def conv_relu(xx):
        idx = jnp.arange(Lc)[:, None] + jnp.arange(K)[None, :]
        p = xx[:, :, idx].transpose(0, 2, 1, 3).reshape(B * Lc, Cin * K)
        o = jnp.maximum(p @ wc.reshape(C, Cin * K).T + bc[None, :], 0.0)
        return o.reshape(B, Lc, C)

    x_rc = jnp.flip(x, axis=(1, 2))
    feat = jnp.concatenate([conv_relu(x), conv_relu(x_rc)], axis=-1)   # (B, Lc, 2C)

    h = jnp.zeros((B, H), jnp.float32)
    c = jnp.zeros((B, H), jnp.float32)
    for t in range(Lc):
        gates = feat[:, t, :] @ wih + h @ whh + blstm
        i = jax.nn.sigmoid(gates[:, :H])
        f = jax.nn.sigmoid(gates[:, H:2 * H])
        g = jnp.tanh(gates[:, 2 * H:3 * H])
        o = jax.nn.sigmoid(gates[:, 3 * H:])
        c = f * c + i * g
        h = o * jnp.tanh(c)
    return h @ wd + bd


# ---------------------------------- main ------------------------------------ #
if __name__ == "__main__":
    B, L = 8, 16            # batch (fills the 8 sublanes), input_len
    A = 4                   # one-hot DNA alphabet
    C, K = 8, 5             # conv channels / kernel size  -> Lc = 12
    H = 32                  # LSTM hidden dim -> 4H = 128 (lane-dense gates)
    O = 3                   # output_dim
    F = 2 * C               # recurrent input dim (concat_cnn)

    key = jax.random.PRNGKey(0)
    ks = jax.random.split(key, 8)

    # deterministic synthetic parameters (PyTorch-equivalent layouts, fused gates i|f|g|o)
    wc = 0.1 * jax.random.normal(ks[0], (C, A, K), jnp.float32)        # Conv1d weight
    bc = 0.1 * jax.random.normal(ks[1], (C,), jnp.float32)             # Conv1d bias
    wih = 0.1 * jax.random.normal(ks[2], (F, 4 * H), jnp.float32)      # LSTM W_ih^T, gates fused
    whh = 0.1 * jax.random.normal(ks[3], (H, 4 * H), jnp.float32)      # LSTM W_hh^T, gates fused
    blstm = 0.1 * jax.random.normal(ks[4], (1, 4 * H), jnp.float32)    # b_ih + b_hh, fused
    wd = 0.1 * jax.random.normal(ks[5], (H, O), jnp.float32)           # Dense weight^T
    bd = 0.1 * jax.random.normal(ks[6], (1, O), jnp.float32)           # Dense bias
    params = (wc, bc, wih, whh, blstm, wd, bd)

    # one-hot DNA input, (B, 4, L) NCL layout like PyTorch
    tokens = jax.random.randint(ks[7], (B, L), 0, A)
    x = jax.nn.one_hot(tokens, A, dtype=jnp.float32).transpose(0, 2, 1)

    # toy-size tiles; production defaults are tile_m>=512, t_chunk~128
    fwd = jax.jit(functools.partial(ds_hybrid_forward, tile_m=32, t_chunk=4,
                                    b_tile=8, unroll=4))
    out = jax.block_until_ready(fwd(x, params))

    ref = jax.block_until_ready(ref_forward(x, params))
    # bf16 operands + bf16 z intermediate -> compare against the f32 reference with
    # a correspondingly looser tolerance.
    np.testing.assert_allclose(np.asarray(out), np.asarray(ref), atol=2e-2, rtol=2e-2)

    print("KERNEL_OK")
</pallas_src>

<mosaic_0001>
module attributes {stable_mosaic.version = 11 : i64} {
  func.func @conv_relu_proj_kernel(%arg0: i32, %arg1: memref<32x20xbf16, #tpu.memory_space<vmem>>, %arg2: memref<32x20xbf16, #tpu.memory_space<vmem>>, %arg3: memref<20x8xbf16, #tpu.memory_space<vmem>>, %arg4: memref<1x8xf32, #tpu.memory_space<vmem>>, %arg5: memref<8x128xbf16, #tpu.memory_space<vmem>>, %arg6: memref<8x128xbf16, #tpu.memory_space<vmem>>, %arg7: memref<1x128xf32, #tpu.memory_space<vmem>>, %arg8: memref<32x128xbf16, #tpu.memory_space<vmem>>) attributes {dimension_semantics = [#tpu.dimension_semantics<parallel>], iteration_bounds = array<i64: 3>, scalar_prefetch = 0 : i64, scratch_operands = 0 : i64, tpu.core_type = #tpu.core_type<tc>, window_params = [{transform_indices = @transform_0, window_bounds = array<i64: 32, 20>}, {transform_indices = @transform_1, window_bounds = array<i64: 32, 20>}, {pipeline_mode = #tpu.pipeline_mode<synchronous>, transform_indices = @transform_2, window_bounds = array<i64: 20, 8>}, {pipeline_mode = #tpu.pipeline_mode<synchronous>, transform_indices = @transform_3, window_bounds = array<i64: 1, 8>}, {pipeline_mode = #tpu.pipeline_mode<synchronous>, transform_indices = @transform_4, window_bounds = array<i64: 8, 128>}, {pipeline_mode = #tpu.pipeline_mode<synchronous>, transform_indices = @transform_5, window_bounds = array<i64: 8, 128>}, {pipeline_mode = #tpu.pipeline_mode<synchronous>, transform_indices = @transform_6, window_bounds = array<i64: 1, 128>}, {transform_indices = @transform_7, window_bounds = array<i64: 32, 128>}]} {
    %c0 = arith.constant 0 : index
    %c0_0 = arith.constant 0 : index
    %0 = vector.load %arg1[%c0, %c0_0] : memref<32x20xbf16, #tpu.memory_space<vmem>>, vector<32x20xbf16>
    %c0_1 = arith.constant 0 : index
    %c0_2 = arith.constant 0 : index
    %1 = vector.load %arg3[%c0_1, %c0_2] : memref<20x8xbf16, #tpu.memory_space<vmem>>, vector<20x8xbf16>
    %cst = arith.constant dense<0.000000e+00> : vector<32x8xf32>
    %2 = tpu.matmul %0, %1, %cst {dimension_numbers = #tpu.dot_dimension_numbers<[1], [0], [0], [1], [0, 0, 1, 1], [], []>} : vector<32x20xbf16>, vector<20x8xbf16>, vector<32x8xf32> -> vector<32x8xf32>
    %c0_3 = arith.constant 0 : index
    %c0_4 = arith.constant 0 : index
    %3 = vector.load %arg4[%c0_3, %c0_4] : memref<1x8xf32, #tpu.memory_space<vmem>>, vector<1x8xf32>
    %4 = vector.broadcast %3 : vector<1x8xf32> to vector<32x8xf32>
    %5 = arith.addf %2, %4 : vector<32x8xf32>
    %cst_5 = arith.constant 0.000000e+00 : f32
    %6 = vector.broadcast %cst_5 : f32 to vector<32x8xf32>
    %7 = arith.maximumf %5, %6 : vector<32x8xf32>
    %c0_6 = arith.constant 0 : index
    %c0_7 = arith.constant 0 : index
    %8 = vector.load %arg2[%c0_6, %c0_7] : memref<32x20xbf16, #tpu.memory_space<vmem>>, vector<32x20xbf16>
    %c0_8 = arith.constant 0 : index
    %c0_9 = arith.constant 0 : index
    %9 = vector.load %arg3[%c0_8, %c0_9] : memref<20x8xbf16, #tpu.memory_space<vmem>>, vector<20x8xbf16>
    %cst_10 = arith.constant dense<0.000000e+00> : vector<32x8xf32>
    %10 = tpu.matmul %8, %9, %cst_10 {dimension_numbers = #tpu.dot_dimension_numbers<[1], [0], [0], [1], [0, 0, 1, 1], [], []>} : vector<32x20xbf16>, vector<20x8xbf16>, vector<32x8xf32> -> vector<32x8xf32>
    %c0_11 = arith.constant 0 : index
    %c0_12 = arith.constant 0 : index
    %11 = vector.load %arg4[%c0_11, %c0_12] : memref<1x8xf32, #tpu.memory_space<vmem>>, vector<1x8xf32>
    %12 = vector.broadcast %11 : vector<1x8xf32> to vector<32x8xf32>
    %13 = arith.addf %10, %12 : vector<32x8xf32>
    %cst_13 = arith.constant 0.000000e+00 : f32
    %14 = vector.broadcast %cst_13 : f32 to vector<32x8xf32>
    %15 = arith.maximumf %13, %14 : vector<32x8xf32>
    %16 = arith.truncf %7 : vector<32x8xf32> to vector<32x8xbf16>
    %c0_14 = arith.constant 0 : index
    %c0_15 = arith.constant 0 : index
    %17 = vector.load %arg5[%c0_14, %c0_15] : memref<8x128xbf16, #tpu.memory_space<vmem>>, vector<8x128xbf16>
    %cst_16 = arith.constant dense<0.000000e+00> : vector<32x128xf32>
    %18 = tpu.matmul %16, %17, %cst_16 {dimension_numbers = #tpu.dot_dimension_numbers<[1], [0], [0], [1], [0, 0, 1, 1], [], []>} : vector<32x8xbf16>, vector<8x128xbf16>, vector<32x128xf32> -> vector<32x128xf32>
    %19 = arith.truncf %15 : vector<32x8xf32> to vector<32x8xbf16>
    %c0_17 = arith.constant 0 : index
    %c0_18 = arith.constant 0 : index
    %20 = vector.load %arg6[%c0_17, %c0_18] : memref<8x128xbf16, #tpu.memory_space<vmem>>, vector<8x128xbf16>
    %cst_19 = arith.constant dense<0.000000e+00> : vector<32x128xf32>
    %21 = tpu.matmul %19, %20, %cst_19 {dimension_numbers = #tpu.dot_dimension_numbers<[1], [0], [0], [1], [0, 0, 1, 1], [], []>} : vector<32x8xbf16>, vector<8x128xbf16>, vector<32x128xf32> -> vector<32x128xf32>
    %22 = arith.addf %18, %21 : vector<32x128xf32>
    %c0_20 = arith.constant 0 : index
    %c0_21 = arith.constant 0 : index
    %23 = vector.load %arg7[%c0_20, %c0_21] : memref<1x128xf32, #tpu.memory_space<vmem>>, vector<1x128xf32>
    %24 = vector.broadcast %23 : vector<1x128xf32> to vector<32x128xf32>
    %25 = arith.addf %22, %24 : vector<32x128xf32>
    %26 = arith.truncf %25 : vector<32x128xf32> to vector<32x128xbf16>
    %c0_22 = arith.constant 0 : index
    %c0_23 = arith.constant 0 : index
    %27 = vector.load %arg8[%c0_22, %c0_23] : memref<32x128xbf16, #tpu.memory_space<vmem>>, vector<32x128xbf16>
    tpu.vector_store %arg8[%c0_22, %c0_23], %26 {strides = array<i32>} : memref<32x128xbf16, #tpu.memory_space<vmem>>, vector<32x128xbf16>,
    return
  }
  func.func @transform_0(%arg0: i32) -> (i32, i32) {
    %c0_i32 = arith.constant 0 : i32
    %c0_i32_0 = arith.constant 0 : i32
    return %arg0, %c0_i32 : i32, i32
  }
  func.func @transform_1(%arg0: i32) -> (i32, i32) {
    %c0_i32 = arith.constant 0 : i32
    %c0_i32_0 = arith.constant 0 : i32
    return %arg0, %c0_i32 : i32, i32
  }
  func.func @transform_2(%arg0: i32) -> (i32, i32) {
    %c0_i32 = arith.constant 0 : i32
    %c0_i32_0 = arith.constant 0 : i32
    %c0_i32_1 = arith.constant 0 : i32
    return %c0_i32, %c0_i32_0 : i32, i32
  }
  func.func @transform_3(%arg0: i32) -> (i32, i32) {
    %c0_i32 = arith.constant 0 : i32
    %c0_i32_0 = arith.constant 0 : i32
    %c0_i32_1 = arith.constant 0 : i32
    return %c0_i32, %c0_i32_0 : i32, i32
  }
  func.func @transform_4(%arg0: i32) -> (i32, i32) {
    %c0_i32 = arith.constant 0 : i32
    %c0_i32_0 = arith.constant 0 : i32
    %c0_i32_1 = arith.constant 0 : i32
    return %c0_i32, %c0_i32_0 : i32, i32
  }
  func.func @transform_5(%arg0: i32) -> (i32, i32) {
    %c0_i32 = arith.constant 0 : i32
    %c0_i32_0 = arith.constant 0 : i32
    %c0_i32_1 = arith.constant 0 : i32
    return %c0_i32, %c0_i32_0 : i32, i32
  }
  func.func @transform_6(%arg0: i32) -> (i32, i32) {
    %c0_i32 = arith.constant 0 : i32
    %c0_i32_0 = arith.constant 0 : i32
    %c0_i32_1 = arith.constant 0 : i32
    return %c0_i32, %c0_i32_0 : i32, i32
  }
  func.func @transform_7(%arg0: i32) -> (i32, i32) {
    %c0_i32 = arith.constant 0 : i32
    %c0_i32_0 = arith.constant 0 : i32
    return %arg0, %c0_i32 : i32, i32
  }
}

module attributes {stable_mosaic.version = 11 : i64} {
  func.func @lstm_dense_kernel(%arg0: i32, %arg1: i32, %arg2: memref<4x8x128xbf16, #tpu.memory_space<vmem>>, %arg3: memref<32x128xf32, #tpu.memory_space<vmem>>, %arg4: memref<32x3xf32, #tpu.memory_space<vmem>>, %arg5: memref<1x3xf32, #tpu.memory_space<vmem>>, %arg6: memref<8x3xf32, #tpu.memory_space<vmem>>, %arg7: memref<8x32xf32, #tpu.memory_space<vmem>>, %arg8: memref<8x32xf32, #tpu.memory_space<vmem>>) attributes {dimension_semantics = [#tpu.dimension_semantics<parallel>, #tpu.dimension_semantics<arbitrary>], iteration_bounds = array<i64: 1, 3>, scalar_prefetch = 0 : i64, scratch_operands = 2 : i64, tpu.core_type = #tpu.core_type<tc>, window_params = [{transform_indices = @transform_0, window_bounds = array<i64: 4, 8, 128>}, {pipeline_mode = #tpu.pipeline_mode<synchronous>, transform_indices = @transform_1, window_bounds = array<i64: 32, 128>}, {pipeline_mode = #tpu.pipeline_mode<synchronous>, transform_indices = @transform_2, window_bounds = array<i64: 32, 3>}, {pipeline_mode = #tpu.pipeline_mode<synchronous>, transform_indices = @transform_3, window_bounds = array<i64: 1, 3>}, {transform_indices = @transform_4, window_bounds = array<i64: 8, 3>}]} {
    %c0_i32 = arith.constant 0 : i32
    %0 = arith.cmpi eq, %arg1, %c0_i32 : i32
    %1 = arith.extui %0 : i1 to i32
    %c0_i32_0 = arith.constant 0 : i32
    %2 = arith.cmpi ne, %1, %c0_i32_0 : i32
    scf.if %2 {
      %cst_42 = arith.constant 0.000000e+00 : f32
      %138 = vector.broadcast %cst_42 : f32 to vector<8x32xf32>
      %c0_43 = arith.constant 0 : index
      %c0_44 = arith.constant 0 : index
      %139 = vector.load %arg7[%c0_43, %c0_44] : memref<8x32xf32, #tpu.memory_space<vmem>>, vector<8x32xf32>
      tpu.vector_store %arg7[%c0_43, %c0_44], %138 {strides = array<i32>} : memref<8x32xf32, #tpu.memory_space<vmem>>, vector<8x32xf32>,
      %cst_45 = arith.constant 0.000000e+00 : f32
      %140 = vector.broadcast %cst_45 : f32 to vector<8x32xf32>
      %c0_46 = arith.constant 0 : index
      %c0_47 = arith.constant 0 : index
      %141 = vector.load %arg8[%c0_46, %c0_47] : memref<8x32xf32, #tpu.memory_space<vmem>>, vector<8x32xf32>
      tpu.vector_store %arg8[%c0_46, %c0_47], %140 {strides = array<i32>} : memref<8x32xf32, #tpu.memory_space<vmem>>, vector<8x32xf32>,
    } else {
    }
    %c0 = arith.constant 0 : index
    %c0_1 = arith.constant 0 : index
    %3 = vector.load %arg7[%c0, %c0_1] : memref<8x32xf32, #tpu.memory_space<vmem>>, vector<8x32xf32>
    %c0_2 = arith.constant 0 : index
    %c0_3 = arith.constant 0 : index
    %4 = vector.load %arg8[%c0_2, %c0_3] : memref<8x32xf32, #tpu.memory_space<vmem>>, vector<8x32xf32>
    %c0_i32_4 = arith.constant 0 : i32
    %5 = arith.index_cast %c0_i32_4 : i32 to index
    %c0_5 = arith.constant 0 : index
    %c0_6 = arith.constant 0 : index
    %6 = vector.load %arg2[%5, %c0_5, %c0_6] : memref<4x8x128xbf16, #tpu.memory_space<vmem>>, vector<1x8x128xbf16>
    %7 = vector.shape_cast %6 : vector<1x8x128xbf16> to vector<8x128xbf16>
    %8 = arith.extf %7 : vector<8x128xbf16> to vector<8x128xf32>
    %c0_7 = arith.constant 0 : index
    %c0_8 = arith.constant 0 : index
    %9 = vector.load %arg3[%c0_7, %c0_8] : memref<32x128xf32, #tpu.memory_space<vmem>>, vector<32x128xf32>
    %cst = arith.constant dense<0.000000e+00> : vector<8x128xf32>
    %10 = tpu.matmul %3, %9, %cst {dimension_numbers = #tpu.dot_dimension_numbers<[1], [0], [0], [1], [0, 0, 1, 1], [], []>} : vector<8x32xf32>, vector<32x128xf32>, vector<8x128xf32> -> vector<8x128xf32>
    %11 = arith.addf %8, %10 : vector<8x128xf32>
    %12 = vector.extract_strided_slice %11 {offsets = [0, 0], sizes = [8, 32], strides = [1, 1]} : vector<8x128xf32> to vector<8x32xf32>
    %13 = arith.negf %12 : vector<8x32xf32>
    %14 = math.exp %13 : vector<8x32xf32>
    %cst_9 = arith.constant 1.000000e+00 : f32
    %15 = vector.broadcast %cst_9 : f32 to vector<8x32xf32>
    %16 = arith.addf %15, %14 : vector<8x32xf32>
    %17 = arith.divf %15, %16 : vector<8x32xf32>
    %18 = vector.extract_strided_slice %11 {offsets = [0, 32], sizes = [8, 32], strides = [1, 1]} : vector<8x128xf32> to vector<8x32xf32>
    %19 = arith.negf %18 : vector<8x32xf32>
    %20 = math.exp %19 : vector<8x32xf32>
    %cst_10 = arith.constant 1.000000e+00 : f32
    %21 = vector.broadcast %cst_10 : f32 to vector<8x32xf32>
    %22 = arith.addf %21, %20 : vector<8x32xf32>
    %23 = arith.divf %21, %22 : vector<8x32xf32>
    %24 = vector.extract_strided_slice %11 {offsets = [0, 64], sizes = [8, 32], strides = [1, 1]} : vector<8x128xf32> to vector<8x32xf32>
    %25 = math.tanh %24 : vector<8x32xf32>
    %26 = vector.extract_strided_slice %11 {offsets = [0, 96], sizes = [8, 32], strides = [1, 1]} : vector<8x128xf32> to vector<8x32xf32>
    %27 = arith.negf %26 : vector<8x32xf32>
    %28 = math.exp %27 : vector<8x32xf32>
    %cst_11 = arith.constant 1.000000e+00 : f32
    %29 = vector.broadcast %cst_11 : f32 to vector<8x32xf32>
    %30 = arith.addf %29, %28 : vector<8x32xf32>
    %31 = arith.divf %29, %30 : vector<8x32xf32>
    %32 = arith.mulf %23, %4 : vector<8x32xf32>
    %33 = arith.mulf %17, %25 : vector<8x32xf32>
    %34 = arith.addf %32, %33 : vector<8x32xf32>
    %35 = math.tanh %34 : vector<8x32xf32>
    %36 = arith.mulf %31, %35 : vector<8x32xf32>
    %c1_i32 = arith.constant 1 : i32
    %37 = arith.index_cast %c1_i32 : i32 to index
    %c0_12 = arith.constant 0 : index
    %c0_13 = arith.constant 0 : index
    %38 = vector.load %arg2[%37, %c0_12, %c0_13] : memref<4x8x128xbf16, #tpu.memory_space<vmem>>, vector<1x8x128xbf16>
    %39 = vector.shape_cast %38 : vector<1x8x128xbf16> to vector<8x128xbf16>
    %40 = arith.extf %39 : vector<8x128xbf16> to vector<8x128xf32>
    %c0_14 = arith.constant 0 : index
    %c0_15 = arith.constant 0 : index
    %41 = vector.load %arg3[%c0_14, %c0_15] : memref<32x128xf32, #tpu.memory_space<vmem>>, vector<32x128xf32>
    %cst_16 = arith.constant dense<0.000000e+00> : vector<8x128xf32>
    %42 = tpu.matmul %36, %41, %cst_16 {dimension_numbers = #tpu.dot_dimension_numbers<[1], [0], [0], [1], [0, 0, 1, 1], [], []>} : vector<8x32xf32>, vector<32x128xf32>, vector<8x128xf32> -> vector<8x128xf32>
    %43 = arith.addf %40, %42 : vector<8x128xf32>
    %44 = vector.extract_strided_slice %43 {offsets = [0, 0], sizes = [8, 32], strides = [1, 1]} : vector<8x128xf32> to vector<8x32xf32>
    %45 = arith.negf %44 : vector<8x32xf32>
    %46 = math.exp %45 : vector<8x32xf32>
    %cst_17 = arith.constant 1.000000e+00 : f32
    %47 = vector.broadcast %cst_17 : f32 to vector<8x32xf32>
    %48 = arith.addf %47, %46 : vector<8x32xf32>
    %49 = arith.divf %47, %48 : vector<8x32xf32>
    %50 = vector.extract_strided_slice %43 {offsets = [0, 32], sizes = [8, 32], strides = [1, 1]} : vector<8x128xf32> to vector<8x32xf32>
    %51 = arith.negf %50 : vector<8x32xf32>
    %52 = math.exp %51 : vector<8x32xf32>
    %cst_18 = arith.constant 1.000000e+00 : f32
    %53 = vector.broadcast %cst_18 : f32 to vector<8x32xf32>
    %54 = arith.addf %53, %52 : vector<8x32xf32>
    %55 = arith.divf %53, %54 : vector<8x32xf32>
    %56 = vector.extract_strided_slice %43 {offsets = [0, 64], sizes = [8, 32], strides = [1, 1]} : vector<8x128xf32> to vector<8x32xf32>
    %57 = math.tanh %56 : vector<8x32xf32>
    %58 = vector.extract_strided_slice %43 {offsets = [0, 96], sizes = [8, 32], strides = [1, 1]} : vector<8x128xf32> to vector<8x32xf32>
    %59 = arith.negf %58 : vector<8x32xf32>
    %60 = math.exp %59 : vector<8x32xf32>
    %cst_19 = arith.constant 1.000000e+00 : f32
    %61 = vector.broadcast %cst_19 : f32 to vector<8x32xf32>
    %62 = arith.addf %61, %60 : vector<8x32xf32>
    %63 = arith.divf %61, %62 : vector<8x32xf32>
    %64 = arith.mulf %55, %34 : vector<8x32xf32>
    %65 = arith.mulf %49, %57 : vector<8x32xf32>
    %66 = arith.addf %64, %65 : vector<8x32xf32>
    %67 = math.tanh %66 : vector<8x32xf32>
    %68 = arith.mulf %63, %67 : vector<8x32xf32>
    %c2_i32 = arith.constant 2 : i32
    %69 = arith.index_cast %c2_i32 : i32 to index
    %c0_20 = arith.constant 0 : index
    %c0_21 = arith.constant 0 : index
    %70 = vector.load %arg2[%69, %c0_20, %c0_21] : memref<4x8x128xbf16, #tpu.memory_space<vmem>>, vector<1x8x128xbf16>
    %71 = vector.shape_cast %70 : vector<1x8x128xbf16> to vector<8x128xbf16>
    %72 = arith.extf %71 : vector<8x128xbf16> to vector<8x128xf32>
    %c0_22 = arith.constant 0 : index
    %c0_23 = arith.constant 0 : index
    %73 = vector.load %arg3[%c0_22, %c0_23] : memref<32x128xf32, #tpu.memory_space<vmem>>, vector<32x128xf32>
    %cst_24 = arith.constant dense<0.000000e+00> : vector<8x128xf32>
    %74 = tpu.matmul %68, %73, %cst_24 {dimension_numbers = #tpu.dot_dimension_numbers<[1], [0], [0], [1], [0, 0, 1, 1], [], []>} : vector<8x32xf32>, vector<32x128xf32>, vector<8x128xf32> -> vector<8x128xf32>
    %75 = arith.addf %72, %74 : vector<8x128xf32>
    %76 = vector.extract_strided_slice %75 {offsets = [0, 0], sizes = [8, 32], strides = [1, 1]} : vector<8x128xf32> to vector<8x32xf32>
    %77 = arith.negf %76 : vector<8x32xf32>
    %78 = math.exp %77 : vector<8x32xf32>
    %cst_25 = arith.constant 1.000000e+00 : f32
    %79 = vector.broadcast %cst_25 : f32 to vector<8x32xf32>
    %80 = arith.addf %79, %78 : vector<8x32xf32>
    %81 = arith.divf %79, %80 : vector<8x32xf32>
    %82 = vector.extract_strided_slice %75 {offsets = [0, 32], sizes = [8, 32], strides = [1, 1]} : vector<8x128xf32> to vector<8x32xf32>
    %83 = arith.negf %82 : vector<8x32xf32>
    %84 = math.exp %83 : vector<8x32xf32>
    %cst_26 = arith.constant 1.000000e+00 : f32
    %85 = vector.broadcast %cst_26 : f32 to vector<8x32xf32>
    %86 = arith.addf %85, %84 : vector<8x32xf32>
    %87 = arith.divf %85, %86 : vector<8x32xf32>
    %88 = vector.extract_strided_slice %75 {offsets = [0, 64], sizes = [8, 32], strides = [1, 1]} : vector<8x128xf32> to vector<8x32xf32>
    %89 = math.tanh %88 : vector<8x32xf32>
    %90 = vector.extract_strided_slice %75 {offsets = [0, 96], sizes = [8, 32], strides = [1, 1]} : vector<8x128xf32> to vector<8x32xf32>
    %91 = arith.negf %90 : vector<8x32xf32>
    %92 = math.exp %91 : vector<8x32xf32>
    %cst_27 = arith.constant 1.000000e+00 : f32
    %93 = vector.broadcast %cst_27 : f32 to vector<8x32xf32>
    %94 = arith.addf %93, %92 : vector<8x32xf32>
    %95 = arith.divf %93, %94 : vector<8x32xf32>
    %96 = arith.mulf %87, %66 : vector<8x32xf32>
    %97 = arith.mulf %81, %89 : vector<8x32xf32>
    %98 = arith.addf %96, %97 : vector<8x32xf32>
    %99 = math.tanh %98 : vector<8x32xf32>
    %100 = arith.mulf %95, %99 : vector<8x32xf32>
    %c3_i32 = arith.constant 3 : i32
    %101 = arith.index_cast %c3_i32 : i32 to index
    %c0_28 = arith.constant 0 : index
    %c0_29 = arith.constant 0 : index
    %102 = vector.load %arg2[%101, %c0_28, %c0_29] : memref<4x8x128xbf16, #tpu.memory_space<vmem>>, vector<1x8x128xbf16>
    %103 = vector.shape_cast %102 : vector<1x8x128xbf16> to vector<8x128xbf16>
    %104 = arith.extf %103 : vector<8x128xbf16> to vector<8x128xf32>
    %c0_30 = arith.constant 0 : index
    %c0_31 = arith.constant 0 : index
    %105 = vector.load %arg3[%c0_30, %c0_31] : memref<32x128xf32, #tpu.memory_space<vmem>>, vector<32x128xf32>
    %cst_32 = arith.constant dense<0.000000e+00> : vector<8x128xf32>
    %106 = tpu.matmul %100, %105, %cst_32 {dimension_numbers = #tpu.dot_dimension_numbers<[1], [0], [0], [1], [0, 0, 1, 1], [], []>} : vector<8x32xf32>, vector<32x128xf32>, vector<8x128xf32> -> vector<8x128xf32>
    %107 = arith.addf %104, %106 : vector<8x128xf32>
    %108 = vector.extract_strided_slice %107 {offsets = [0, 0], sizes = [8, 32], strides = [1, 1]} : vector<8x128xf32> to vector<8x32xf32>
    %109 = arith.negf %108 : vector<8x32xf32>
    %110 = math.exp %109 : vector<8x32xf32>
    %cst_33 = arith.constant 1.000000e+00 : f32
    %111 = vector.broadcast %cst_33 : f32 to vector<8x32xf32>
    %112 = arith.addf %111, %110 : vector<8x32xf32>
    %113 = arith.divf %111, %112 : vector<8x32xf32>
    %114 = vector.extract_strided_slice %107 {offsets = [0, 32], sizes = [8, 32], strides = [1, 1]} : vector<8x128xf32> to vector<8x32xf32>
    %115 = arith.negf %114 : vector<8x32xf32>
    %116 = math.exp %115 : vector<8x32xf32>
    %cst_34 = arith.constant 1.000000e+00 : f32
    %117 = vector.broadcast %cst_34 : f32 to vector<8x32xf32>
    %118 = arith.addf %117, %116 : vector<8x32xf32>
    %119 = arith.divf %117, %118 : vector<8x32xf32>
    %120 = vector.extract_strided_slice %107 {offsets = [0, 64], sizes = [8, 32], strides = [1, 1]} : vector<8x128xf32> to vector<8x32xf32>
    %121 = math.tanh %120 : vector<8x32xf32>
    %122 = vector.extract_strided_slice %107 {offsets = [0, 96], sizes = [8, 32], strides = [1, 1]} : vector<8x128xf32> to vector<8x32xf32>
    %123 = arith.negf %122 : vector<8x32xf32>
    %124 = math.exp %123 : vector<8x32xf32>
    %cst_35 = arith.constant 1.000000e+00 : f32
    %125 = vector.broadcast %cst_35 : f32 to vector<8x32xf32>
    %126 = arith.addf %125, %124 : vector<8x32xf32>
    %127 = arith.divf %125, %126 : vector<8x32xf32>
    %128 = arith.mulf %119, %98 : vector<8x32xf32>
    %129 = arith.mulf %113, %121 : vector<8x32xf32>
    %130 = arith.addf %128, %129 : vector<8x32xf32>
    %131 = math.tanh %130 : vector<8x32xf32>
    %132 = arith.mulf %127, %131 : vector<8x32xf32>
    %c4_i32 = arith.constant 4 : i32
    %c0_36 = arith.constant 0 : index
    %c0_37 = arith.constant 0 : index
    %133 = vector.load %arg7[%c0_36, %c0_37] : memref<8x32xf32, #tpu.memory_space<vmem>>, vector<8x32xf32>
    tpu.vector_store %arg7[%c0_36, %c0_37], %132 {strides = array<i32>} : memref<8x32xf32, #tpu.memory_space<vmem>>, vector<8x32xf32>,
    %c0_38 = arith.constant 0 : index
    %c0_39 = arith.constant 0 : index
    %134 = vector.load %arg8[%c0_38, %c0_39] : memref<8x32xf32, #tpu.memory_space<vmem>>, vector<8x32xf32>
    tpu.vector_store %arg8[%c0_38, %c0_39], %130 {strides = array<i32>} : memref<8x32xf32, #tpu.memory_space<vmem>>, vector<8x32xf32>,
    %c2_i32_40 = arith.constant 2 : i32
    %135 = arith.cmpi eq, %arg1, %c2_i32_40 : i32
    %136 = arith.extui %135 : i1 to i32
    %c0_i32_41 = arith.constant 0 : i32
    %137 = arith.cmpi ne, %136, %c0_i32_41 : i32
    scf.if %137 {
      %c0_42 = arith.constant 0 : index
      %c0_43 = arith.constant 0 : index
      %138 = vector.load %arg4[%c0_42, %c0_43] : memref<32x3xf32, #tpu.memory_space<vmem>>, vector<32x3xf32>
      %cst_44 = arith.constant dense<0.000000e+00> : vector<8x3xf32>
      %139 = tpu.matmul %132, %138, %cst_44 {dimension_numbers = #tpu.dot_dimension_numbers<[1], [0], [0], [1], [0, 0, 1, 1], [], []>} : vector<8x32xf32>, vector<32x3xf32>, vector<8x3xf32> -> vector<8x3xf32>
      %c0_45 = arith.constant 0 : index
      %c0_46 = arith.constant 0 : index
      %140 = vector.load %arg5[%c0_45, %c0_46] : memref<1x3xf32, #tpu.memory_space<vmem>>, vector<1x3xf32>
      %141 = vector.broadcast %140 : vector<1x3xf32> to vector<8x3xf32>
      %142 = arith.addf %139, %141 : vector<8x3xf32>
      %c0_47 = arith.constant 0 : index
      %c0_48 = arith.constant 0 : index
      %143 = vector.load %arg6[%c0_47, %c0_48] : memref<8x3xf32, #tpu.memory_space<vmem>>, vector<8x3xf32>
      tpu.vector_store %arg6[%c0_47, %c0_48], %142 {strides = array<i32>} : memref<8x3xf32, #tpu.memory_space<vmem>>, vector<8x3xf32>,
    } else {
    }
    return
  }
  func.func @transform_0(%arg0: i32, %arg1: i32) -> (i32, i32, i32) {
    %c0_i32 = arith.constant 0 : i32
    %c0_i32_0 = arith.constant 0 : i32
    return %arg1, %arg0, %c0_i32 : i32, i32, i32
  }
  func.func @transform_1(%arg0: i32, %arg1: i32) -> (i32, i32) {
    %c0_i32 = arith.constant 0 : i32
    %c0_i32_0 = arith.constant 0 : i32
    %c0_i32_1 = arith.constant 0 : i32
    return %c0_i32, %c0_i32_0 : i32, i32
  }
  func.func @transform_2(%arg0: i32, %arg1: i32) -> (i32, i32) {
    %c0_i32 = arith.constant 0 : i32
    %c0_i32_0 = arith.constant 0 : i32
    %c0_i32_1 = arith.constant 0 : i32
    return %c0_i32, %c0_i32_0 : i32, i32
  }
  func.func @transform_3(%arg0: i32, %arg1: i32) -> (i32, i32) {
    %c0_i32 = arith.constant 0 : i32
    %c0_i32_0 = arith.constant 0 : i32
    %c0_i32_1 = arith.constant 0 : i32
    return %c0_i32, %c0_i32_0 : i32, i32
  }
  func.func @transform_4(%arg0: i32, %arg1: i32) -> (i32, i32) {
    %c0_i32 = arith.constant 0 : i32
    %c0_i32_0 = arith.constant 0 : i32
    return %arg0, %c0_i32 : i32, i32
  }
}

</mosaic_0001>

<bundles_post_ra>
// kernel: reverse
= control target key start
LH: loop header
LB: loop body
LE: loop exit
PB: predicated region body
PF: predicated region fallthrough
CT: control target
= control target key end

     0   :  { %v2_v0 = vlaneseq  ;;  %s682_s0 = inlined_call_operand.vmem [shape: bf16[8,4,12], index: 0, kind: input, shape index: {}]   ;;  %s683_s1 = inlined_call_operand.vmem [shape: bf16[8,4,12], index: 1, kind: output, shape index: {}]  }
   0x2   :  { %v3_v1 = vsub.s32 11, %v2_v0 }
   0x4   :  { %4 = vset.pattern.permute.xlu0 %v3_v1 }
   0x5   :  { %613 = vset.pattern.permute.xlu2 %v3_v1  ;;  %612 = vset.pattern.permute.xlu1 %v3_v1  ;;  %v311_v2 = vld [vmem:[#allocation1] sm:$0x3]  ;;  %v282_v3 = vld [vmem:[#allocation1 + $0x4] sm:$0x3]  ;;  %v252_v4 = vld [vmem:[#allocation1 + $0x8] sm:$0x3] }
   0x6   :  { %v312_v5 = vunpack.c.l.bf16 %v311_v2  ;;  %v283_v6 = vunpack.c.l.bf16 %v282_v3  ;;  %v253_v7 = vunpack.c.l.bf16 %v252_v4  ;;  %v222_v8 = vld [vmem:[#allocation1 + $0xc] sm:$0x3]  ;;  %v192_v9 = vld [vmem:[#allocation1 + $0x10] sm:$0x3]  ;;  %v162_v10 = vld [vmem:[#allocation1 + $0x14] sm:$0x3] }
   0x7   :  { %v223_v11 = vunpack.c.l.bf16 %v222_v8  ;;  %v193_v12 = vunpack.c.l.bf16 %v192_v9  ;;  %v163_v13 = vunpack.c.l.bf16 %v162_v10  ;;  %v26_v14 = vld [vmem:[%s682_s0 + $0x4] sm:$0x3]  ;;  %v102_v15 = vld [vmem:[#allocation1 + $0x1c] sm:$0x3]  ;;  %v24_v16 = vld [vmem:[%s682_s0 + $0x2] sm:$0x3] }
   0x8   :  { %314 = vst [vmem:[#allocation0] sm:$0xf] %v312_v5  ;;  %v132_v17 = vld [vmem:[#allocation1 + $0x18] sm:$0x3]  ;;  %v22_v18 = vld [vmem:[%s682_s0] sm:$0x3]  ;;  %v103_v20 = vunpack.c.l.bf16 %v102_v15 }
   0x9   :  { %286 = vst [vmem:[#allocation0 + $0x10] sm:$0xf] %v283_v6  ;;  %v28_v19 = vld [vmem:[%s682_s0 + $0x6] sm:$0x3]  ;;  %v133_v22 = vunpack.c.l.bf16 %v132_v17  ;;  %v34_v23 = vld [vmem:[%s682_s0 + $0xc] sm:$0x3] }
   0xa   :  { %256 = vst [vmem:[#allocation0 + $0x20] sm:$0xf] %v253_v7  ;;  %v32_v29 = vld [vmem:[%s682_s0 + $0xa] sm:$0x3]  ;;  %v30_v31 = vld [vmem:[%s682_s0 + $0x8] sm:$0x3] }
   0xb   :  { %226 = vst [vmem:[#allocation0 + $0x30] sm:$0xf] %v223_v11  ;;  %v36_v33 = vld [vmem:[%s682_s0 + $0xe] sm:$0x3]  ;;  %v328_v0 = vshrl.u32 %v2_v0, 7 }
   0xc   :  { %196 = vst [vmem:[#allocation0 + $0x40] sm:$0xf] %v193_v12 }
   0xd   :  { %166 = vst [vmem:[#allocation0 + $0x50] sm:$0xf] %v163_v13  ;;  %vm329_vm0 = vcmp.lt.s32.totalorder %v328_v0, 4 }
   0xe   :  { %27 = vst [vmem:[#allocation1 + $0xa] sm:$0x3] %v26_v14 }
   0xf   :  { %v316_v21 = vld [vmem:[#allocation0 + $0x7] ss:$-1 sm:$0xff]  ;;  %25 = vst [vmem:[#allocation1 + $0x6] sm:$0x3] %v24_v16 }
  0x10   :  { %v317_v24 = vrot.slane %v316_v21, 4  ;;  %v334_v25 = vld [vmem:[#allocation0 + $0x17] ss:$-1 sm:$0xff]  ;;  %23 = vst [vmem:[#allocation1 + $0x2] sm:$0x3] %v22_v18 }
  0x11   :  { %v335_v26 = vrot.slane %v334_v25, 4  ;;  %v352_v27 = vld [vmem:[#allocation0 + $0x27] ss:$-1 sm:$0xff]  ;;  %29 = vst [vmem:[#allocation1 + $0xe] sm:$0x3] %v28_v19 }
  0x12   :  { %318 = vperm.xlu0 %4, %v317_v24   ;;  %v353_v28 = vrot.slane %v352_v27, 4  ;;  %106 = vst [vmem:[#allocation0 + $0x70] sm:$0xf] %v103_v20  ;;  %v370_v30 = vld [vmem:[#allocation0 + $0x37] ss:$-1 sm:$0xff] }
  0x13   :  { %336 = vperm.xlu1 %612, %v335_v26   ;;  %136 = vst [vmem:[#allocation0 + $0x60] sm:$0xf] %v133_v22  ;;  %v388_v32 = vld [vmem:[#allocation0 + $0x47] ss:$-1 sm:$0xff]  ;;  %v371_v36 = vrot.slane %v370_v30, 4 }
  0x14   :  { %354 = vperm.xlu2 %613, %v353_v28   ;;  %35 = vst [vmem:[#allocation1 + $0x1a] sm:$0x3] %v34_v23  ;;  %v406_v34 = vld [vmem:[#allocation0 + $0x57] ss:$-1 sm:$0xff]  ;;  %v389_v39 = vrot.slane %v388_v32, 4 }
  0x15   :  { %v237_v35 = vld [vmem:[#allocation1 + $0xa] sm:$0x3]  ;;  %33 = vst [vmem:[#allocation1 + $0x16] sm:$0x3] %v32_v29  ;;  %v407_v42 = vrot.slane %v406_v34, 4 }
  0x16   :  { %v238_v37 = vunpack.c.l.bf16 %v237_v35  ;;  %v267_v38 = vld [vmem:[#allocation1 + $0x6] sm:$0x3]  ;;  %31 = vst [vmem:[#allocation1 + $0x12] sm:$0x3] %v30_v31 }
  0x17   :  { %v268_v40 = vunpack.c.l.bf16 %v267_v38  ;;  %v297_v41 = vld [vmem:[#allocation1 + $0x2] sm:$0x3]  ;;  %37 = vst [vmem:[#allocation1 + $0x1e] sm:$0x3] %v36_v33 }
  0x18   :  { %241 = vst [vmem:[#allocation0 + $0x28] sm:$0xf] %v238_v37  ;;  %v298_v43 = vunpack.c.l.bf16 %v297_v41  ;;  %v207_v44 = vld [vmem:[#allocation1 + $0xe] sm:$0x3] }
  0x19   :  { %271 = vst [vmem:[#allocation0 + $0x18] sm:$0xf] %v268_v40  ;;  %v208_v45 = vunpack.c.l.bf16 %v207_v44  ;;  %v442_v60 = vld [vmem:[#allocation0 + $0x77] ss:$-1 sm:$0xff] }
  0x1a   :  { %372 = vperm.xlu0 %4, %v371_v36   ;;  %301 = vst [vmem:[#allocation0 + $0x8] sm:$0xf] %v298_v43  ;;  %v424_v62 = vld [vmem:[#allocation0 + $0x67] ss:$-1 sm:$0xff]  ;;  %v443_v63 = vrot.slane %v442_v60, 4 }
  0x1b   :  { %390 = vperm.xlu1 %612, %v389_v39   ;;  %211 = vst [vmem:[#allocation0 + $0x38] sm:$0xf] %v208_v45  ;;  %v117_v46 = vld [vmem:[#allocation1 + $0x1a] sm:$0x3]  ;;  %v425_v2 = vrot.slane %v424_v62, 4 }
  0x1c   :  { %408 = vperm.xlu2 %613, %v407_v42   ;;  %v118_v47 = vunpack.c.l.bf16 %v117_v46  ;;  %v147_v48 = vld [vmem:[#allocation1 + $0x16] sm:$0x3] }
  0x1d   :  { %v148_v49 = vunpack.c.l.bf16 %v147_v48  ;;  %v177_v50 = vld [vmem:[#allocation1 + $0x12] sm:$0x3] }
  0x1e   :  { %121 = vst [vmem:[#allocation0 + $0x68] sm:$0xf] %v118_v47  ;;  %v178_v51 = vunpack.c.l.bf16 %v177_v50  ;;  %v87_v52 = vld [vmem:[#allocation1 + $0x1e] sm:$0x3] }
  0x1f   :  { %v359_v53 = vld [vmem:[#allocation0 + $0x2f] ss:$-1 sm:$0xff]  ;;  %151 = vst [vmem:[#allocation0 + $0x58] sm:$0xf] %v148_v49  ;;  %v88_v54 = vunpack.c.l.bf16 %v87_v52 }
  0x20   :  { %v360_v55 = vrot.slane %v359_v53, 4  ;;  %v341_v56 = vld [vmem:[#allocation0 + $0x1f] ss:$-1 sm:$0xff]  ;;  %181 = vst [vmem:[#allocation0 + $0x48] sm:$0xf] %v178_v51 }
  0x21   :  { %v342_v57 = vrot.slane %v341_v56, 4  ;;  %v323_v58 = vld [vmem:[#allocation0 + $0xf] ss:$-1 sm:$0xff]  ;;  %91 = vst [vmem:[#allocation0 + $0x78] sm:$0xf] %v88_v54 }
  0x22   :  { %v324_v59 = vrot.slane %v323_v58, 4  ;;  %v377_v61 = vld [vmem:[#allocation0 + $0x3f] ss:$-1 sm:$0xff] }
  0x23   :  { %343 = vperm.xlu1 %612, %v342_v57   ;;  %v378_v1 = vrot.slane %v377_v61, 4 }
  0x24   :  { %361 = vperm.xlu2 %613, %v360_v55   ;;  %325 = vperm.xlu0 %4, %v324_v59  }
  0x25   :  { %v431_v4 = vld [vmem:[#allocation0 + $0x6f] ss:$-1 sm:$0xff] }
  0x26   :  { %v413_v3 = vld [vmem:[#allocation0 + $0x5f] ss:$-1 sm:$0xff]  ;;  %v432_v7 = vrot.slane %v431_v4, 4 }
  0x27   :  { %v395_v5 = vld [vmem:[#allocation0 + $0x4f] ss:$-1 sm:$0xff]  ;;  %v414_v6 = vrot.slane %v413_v3, 4 }
  0x28   :  { %v396_v8 = vrot.slane %v395_v5, 4  ;;  %v449_v9 = vld [vmem:[#allocation0 + $0x7f] ss:$-1 sm:$0xff] }
  0x29   :  { %v450_v10 = vrot.slane %v449_v9, 4 }
  0x2b   :  { %444 = vperm.xlu1 %612, %v443_v63  }
  0x2c   :  { %379 = vperm.xlu2 %613, %v378_v1   ;;  %426 = vperm.xlu0 %4, %v425_v2  }
  0x33   :  { %415 = vperm.xlu1 %612, %v414_v6  }
  0x34   :  { %433 = vperm.xlu2 %613, %v432_v7   ;;  %397 = vperm.xlu0 %4, %v396_v8  }
  0x3c   :  { %451 = vperm.xlu0 %4, %v450_v10  }
  0x6e   :  { %v355_v11 = vpop.permute.xlu2 %354 }
  0x6f   :  { %356 = vst [vmem:[#allocation2 + $0x10] sm:$0xff] %v355_v11 }
  0x76   :  { %v409_v12 = vpop.permute.xlu2 %408 }
  0x77   :  { %410 = vst [vmem:[#allocation2 + $0x28] sm:$0xff] %v409_v12 }
  0x7e   :  { %v362_v13 = vpop.permute.xlu2 %361 }
  0x7f   :  { %366 = vst.msk [vmem:[#allocation2 + $0x10] sm:$0xff] %vm329_vm0, %v362_v13 }
  0x84   :  { %v319_v14 = vpop.permute.xlu0 %318 }
  0x85   :  { %320 = vst [vmem:[#allocation2] sm:$0xff] %v319_v14  ;;  %v337_v15 = vpop.permute.xlu1 %336 }
  0x86   :  { %v472_v16 = vld [vmem:[#allocation2 + $0x10] sm:$0xf]  ;;  %338 = vst [vmem:[#allocation2 + $0x8] sm:$0xff] %v337_v15  ;;  %v380_v17 = vpop.permute.xlu2 %379 }
  0x87   :  { %v473_v18 = vpack.c.bf16 0.0, %v472_v16 }
  0x89   :  { %477 = vst [vmem:[#allocation3 + $0x4] sm:$0x3] %v473_v18 }
  0x8c   :  { %v373_v19 = vpop.permute.xlu0 %372 }
  0x8d   :  { %374 = vst [vmem:[#allocation2 + $0x18] sm:$0xff] %v373_v19  ;;  %v391_v20 = vpop.permute.xlu1 %390 }
  0x8e   :  { %384 = vst.msk [vmem:[#allocation2 + $0x18] sm:$0xff] %vm329_vm0, %v380_v17  ;;  %v434_v21 = vpop.permute.xlu2 %433 }
  0x8f   :  { %392 = vst [vmem:[#allocation2 + $0x20] sm:$0xff] %v391_v20 }
  0x90   :  { %v533_v22 = vld [vmem:[#allocation3 + $0x4] sm:$0x3] }
  0x91   :  { %534 = vst [vmem:[%s683_s1 + $0x4] sm:$0x3] %v533_v22 }
  0x95   :  { %v479_v23 = vld [vmem:[#allocation2 + $0x18] sm:$0xf]  ;;  %v344_v24 = vpop.permute.xlu1 %343 }
  0x96   :  { %v480_v25 = vpack.c.bf16 0.0, %v479_v23  ;;  %348 = vst.msk [vmem:[#allocation2 + $0x8] sm:$0xff] %vm329_vm0, %v344_v24  ;;  %v326_v26 = vpop.permute.xlu0 %325 }
  0x97   :  { %330 = vst.msk [vmem:[#allocation2] sm:$0xff] %vm329_vm0, %v326_v26 }
  0x98   :  { %484 = vst [vmem:[#allocation3 + $0x6] sm:$0x3] %v480_v25 }
  0x9d   :  { %v465_v27 = vld [vmem:[#allocation2 + $0x8] sm:$0xf]  ;;  %v445_v28 = vpop.permute.xlu1 %444 }
  0x9e   :  { %v466_v29 = vpack.c.bf16 0.0, %v465_v27  ;;  %v459_v30 = vld [vmem:[#allocation2] sm:$0xf]  ;;  %446 = vst [vmem:[#allocation2 + $0x38] sm:$0xff] %v445_v28  ;;  %v427_v31 = vpop.permute.xlu0 %426 }
  0x9f   :  { %v460_v32 = vpack.c.bf16 0.0, %v459_v30  ;;  %v535_v33 = vld [vmem:[#allocation3 + $0x6] sm:$0x3]  ;;  %428 = vst [vmem:[#allocation2 + $0x30] sm:$0xff] %v427_v31 }
  0xa0   :  { %470 = vst [vmem:[#allocation3 + $0x2] sm:$0x3] %v466_v29 }
  0xa1   :  { %463 = vst [vmem:[#allocation3] sm:$0x3] %v460_v32 }
  0xa2   :  { %536 = vst [vmem:[%s683_s1 + $0x6] sm:$0x3] %v535_v33 }
  0xa3   :  { %438 = vst.msk [vmem:[#allocation2 + $0x30] sm:$0xff] %vm329_vm0, %v434_v21 }
  0xa5   :  { %v416_v34 = vpop.permute.xlu1 %415 }
  0xa6   :  { %420 = vst.msk [vmem:[#allocation2 + $0x28] sm:$0xff] %vm329_vm0, %v416_v34  ;;  %v398_v35 = vpop.permute.xlu0 %397 }
  0xa7   :  { %v531_v36 = vld [vmem:[#allocation3 + $0x2] sm:$0x3]  ;;  %402 = vst.msk [vmem:[#allocation2 + $0x20] sm:$0xff] %vm329_vm0, %v398_v35 }
  0xa8   :  { %532 = vst [vmem:[%s683_s1 + $0x2] sm:$0x3] %v531_v36  ;;  %v529_v37 = vld [vmem:[#allocation3] sm:$0x3] }
  0xa9   :  { %530 = vst [vmem:[%s683_s1] sm:$0x3] %v529_v37 }
  0xaa   :  { %v500_v38 = vld [vmem:[#allocation2 + $0x30] sm:$0xf] }
  0xab   :  { %v501_v39 = vpack.c.bf16 0.0, %v500_v38 }
  0xad   :  { %v493_v40 = vld [vmem:[#allocation2 + $0x28] sm:$0xf]  ;;  %505 = vst [vmem:[#allocation3 + $0xc] sm:$0x3] %v501_v39 }
  0xae   :  { %v494_v41 = vpack.c.bf16 0.0, %v493_v40  ;;  %v486_v42 = vld [vmem:[#allocation2 + $0x20] sm:$0xf]  ;;  %v452_v43 = vpop.permute.xlu0 %451 }
  0xaf   :  { %v487_v44 = vpack.c.bf16 0.0, %v486_v42  ;;  %456 = vst.msk [vmem:[#allocation2 + $0x38] sm:$0xff] %vm329_vm0, %v452_v43 }
  0xb0   :  { %498 = vst [vmem:[#allocation3 + $0xa] sm:$0x3] %v494_v41 }
  0xb1   :  { %491 = vst [vmem:[#allocation3 + $0x8] sm:$0x3] %v487_v44 }
  0xb4   :  { %v541_v45 = vld [vmem:[#allocation3 + $0xc] sm:$0x3] }
  0xb5   :  { %542 = vst [vmem:[%s683_s1 + $0xc] sm:$0x3] %v541_v45 }
  0xb6   :  { %v507_v46 = vld [vmem:[#allocation2 + $0x38] sm:$0xf] }
  0xb7   :  { %v539_v47 = vld [vmem:[#allocation3 + $0xa] sm:$0x3]  ;;  %v508_v48 = vpack.c.bf16 0.0, %v507_v46 }
  0xb8   :  { %540 = vst [vmem:[%s683_s1 + $0xa] sm:$0x3] %v539_v47  ;;  %v537_v49 = vld [vmem:[#allocation3 + $0x8] sm:$0x3] }
  0xb9   :  { %538 = vst [vmem:[%s683_s1 + $0x8] sm:$0x3] %v537_v49 }
  0xba   :  { %512 = vst [vmem:[#allocation3 + $0xe] sm:$0x3] %v508_v48 }
  0xc1   :  { %v543_v50 = vld [vmem:[#allocation3 + $0xe] sm:$0x3] }
  0xc2   :  { %544 = vst [vmem:[%s683_s1 + $0xe] sm:$0x3] %v543_v50 }

// kernel: ds_hybrid_forward.3
= control target key start
LH: loop header
LB: loop body
LE: loop exit
PB: predicated region body
PF: predicated region fallthrough
CT: control target
= control target key end

     0   :  { %s745_s15 = smov 0   ;;  %s747_s16 = smov 0   ;;  %s838_s0 = inlined_call_operand.vmem [shape: bf16[12,8,128], index: 0, kind: input, shape index: {}]   ;;  %s839_s1 = inlined_call_operand.vmem [shape: f32[32,128], index: 1, kind: input, shape index: {}]   ;;  %s840_s2 = inlined_call_operand.vmem [shape: f32[32,3], index: 2, kind: input, shape index: {}]   ;;  %s841_s3 = inlined_call_operand.vmem [shape: f32[1,3], index: 3, kind: input, shape index: {}]   ;;  %s842_s4 = inlined_call_operand.vmem [shape: f32[8,3], index: 4, kind: output, shape index: {}]  }
   0x1   :  { %s749_s17 = smov 0  }
   0x2 LB: > { %s23_s18 = sadd.s32 1, %s710_s16  ;;  %p611_p0 = scmp.ge.s32.totalorder %s714_s17, 1  ;;  %s714_s17 = sphi %s749_s17, %s14_s17   ;;  %s710_s16 = sphi %s747_s16, %s844_s16   ;;  %s706_s15 = sphi %s745_s15, %s843_s15  }
   0x3   : > { %p24_p1 = scmp.ge.s32.totalorder %s23_s18, 3  ;;  %p180_p2 = scmp.lt.s32.totalorder %s714_s17, 4 }
   0x5   : > { %s846_s18 = smov (%p24_p1, %s23_s18), 0  ;;  %p181_p3 = pnand %p611_p0, %p180_p2 }
   0x6   : > { %s612_s19 = sshll.u32 (!%p181_p3), %s706_s15, 2  ;;  %p614_p5 = scmp.ne.s32.totalorder (!%p181_p3), %s706_s15, 0 }
   0x7   : > { %184 = sbr.rel (%p181_p3) target bundleno = 2490 (0x9ba), region = 36  ;;  %p209_p4 = scmp.lt.s32.totalorder (!%p181_p3), %s612_s19, 11 }
   0xc   : > { %s848_s19 = smov (!%p209_p4, %s612_s19), 11  ;;  %224 = sbr.rel (%p614_p5) target bundleno = 20 (0x14), region = 40 }
   0xd   : > { %s613_s20 = sshll.u32 %s848_s19, 2 }
   0xe   : > { %s769_s23 = scalar_lea.vmem %s838_s0, %s613_s20 }
  0x11   : > { %vm225_vm0 = vcmask 261120   ;;  %v716_v0 = vmov 0.0  }
  0x12   : > { %226 = vst.msk [vmem:[#allocation2] sm:$0xff] %vm225_vm0, %v716_v0 }
  0x13   : > { %227 = vst.msk [vmem:[#allocation3] sm:$0xff] %vm225_vm0, %v716_v0 }
  0x14 PF: > { %v235_v1 = vld [vmem:[%s839_s1 + $0x18] sm:$0xff]  ;;  %v234_v2 = vld [vmem:[%s839_s1 + $0x10] sm:$0xff]  ;;  %v233_v3 = vld [vmem:[%s839_s1 + $0x8] sm:$0xff]  ;;  %vm236_vm1 = vcmask 261120   ;;  %s717_s6 = smov 64   ;;  %s718_s7 = smov 32  }
  0x15   : > { %252 = vmatpush.msra.mxu0 %v235_v1  ;;  %322 = vmatpush.msra.mxu1 %v235_v1  ;;  %v232_v4 = vld [vmem:[%s839_s1] sm:$0xff]  ;;  %v620_v61 = vld [vmem:[%s769_s23 + $0x8] sm:$0xff]   ;;  %s719_s8 = smov 96   ;;  %p626_p6 = scmp.ne.s32.totalorder %s706_s15, 2 }
  0x16   : > { %388 = vmatpush.msra.mxu2 %v235_v1  ;;  %454 = vmatpush.msra.mxu3 %v235_v1  ;;  %v230_v6 = vld [vmem:[%s769_s23] sm:$0xff]   ;;  %v370_v62 = vunpack.c.l.bf16 %v620_v61 }
  0x17   : > { %253 = vmatpush.msra.mxu0 %v234_v2  ;;  %323 = vmatpush.msra.mxu1 %v234_v2  ;;  %v231_v7 = vunpack.c.l.bf16 %v230_v6  ;;  %v304_v35 = vunpack.c.h.bf16 %v230_v6 }
  0x18   : > { %389 = vmatpush.msra.mxu2 %v234_v2  ;;  %455 = vmatpush.msra.mxu3 %v234_v2 }
  0x19   : > { %254 = vmatpush.msra.mxu0 %v233_v3  ;;  %v228_v5 = vld [vmem:[#allocation2] sm:$0xff]  ;;  %324 = vmatpush.msra.mxu1 %v233_v3 }
  0x1a   : > { %390 = vmatpush.msra.mxu2 %v233_v3  ;;  %456 = vmatpush.msra.mxu3 %v233_v3  ;;  %v229_v11 = vld [vmem:[#allocation3] sm:$0xff] }
  0x1b   : > { %255 = vmatpush.msra.mxu0 %v232_v4  ;;  %325 = vmatpush.msra.mxu1 %v232_v4 }
  0x1c   : > { %615 = vmatmul.msk.f32.vlgmr.msra.gmra.mxu0 %vm236_vm1, %v228_v5  ;;  %391 = vmatpush.msra.mxu2 %v232_v4 }
  0x1d   : > { %457 = vmatpush.msra.mxu3 %v232_v4 }
  0x99   : > { %v257_v8 = vpop.f32.mrf.mxu0 }
  0x9a   : > { %v260_v9 = vadd.f32 %v257_v8, %v231_v7 }
  0x9c   : > { %659 = vtanh.f32 %v260_v9  ;;  %v616_v12 = vmul.f32 -1.442695, %v260_v9 }
  0x9e   : > { %661 = vpow2.f32 %v616_v12 }
  0xa2   : > { %v660_v10 = vpop.eup %659 }
  0xa3   : > { %287 = vrot.lane.b32.xlu0 %v660_v10, %s717_s6 }
  0xa4   : > { %v662_v13 = vpop.eup %661 }
  0xa5   : > { %v264_v14 = vadd.f32 1.0, %v662_v13 }
  0xa7   : > { %663 = vrcp.f32 %v264_v14  ;;  %v276_v20 = vand.u32 2147483648, %v264_v14  ;;  %vm270_vm3 = vweird.f32 %v264_v14  ;;  %v274_v21 = vand.u32 2147483647, %v264_v14 }
  0xa9   : > { %v277_v23 = vor.u32 1.1754944e-38, %v276_v20  ;;  %vm275_vm5 = vcmp.eq.f32.partialorder %v274_v21, 8.507059e+37 }
  0xab   : > { %282 = vrot.lane.b32.xlu0 %v229_v11, %s718_s7 }
  0xad   : > { %v664_v15 = vpop.eup %663 }
  0xae   : > { %v266_v16 = vmul.f32 %v664_v15, %v264_v14  ;;  %vm271_vm2 = vweird.f32 %v664_v15 }
  0xaf   : > { %vm272_vm4 = vmor %vm270_vm3, %vm271_vm2 }
  0xb0   : > { %v267_v17 = vsub.f32 1.0, %v266_v16 }
  0xb2   : > { %v268_v18 = vmul.f32 %v664_v15, %v267_v17 }
  0xb4   : > { %v269_v19 = vadd.f32 %v664_v15, %v268_v18 }
  0xb6   : > { %v273_v22 = vsel %vm272_vm4, %v664_v15, %v269_v19 }
  0xb7   : > { %v278_v25 = vsel %vm275_vm5, %v277_v23, %v273_v22 }
 0x115   : > { %v288_v24 = vpop.permute.xlu0 %287 }
 0x116   : > { %v290_v26 = vmul.f32 %v288_v24, %v278_v25  ;;  %v436_v24 = vunpack.c.h.bf16 %v620_v61 }
 0x118   : > { %292 = vrot.lane.b32.xlu1 %v290_v26, %s718_s7 }
 0x11d   : > { %v283_v27 = vpop.permute.xlu0 %282 }
 0x11e   : > { %v285_v28 = vmul.f32 %v283_v27, %v278_v25 }
 0x18a   : > { %v293_v29 = vpop.permute.xlu1 %292 }
 0x18b   : > { %v295_v30 = vadd.f32 %v293_v29, %v285_v28 }
 0x18d   : > { %665 = vtanh.f32 %v295_v30 }
 0x193   : > { %v666_v31 = vpop.eup %665 }
 0x194   : > { %298 = vrot.lane.b32.xlu1 %v666_v31, %s717_s6 }
 0x206   : > { %v299_v32 = vpop.permute.xlu1 %298 }
 0x207   : > { %v301_v33 = vmul.f32 %v299_v32, %v278_v25 }
 0x209   : > { %306 = vrot.lane.b32.xlu2 %v301_v33, %s718_s7 }
 0x263   : > { %v307_v34 = vpop.permute.xlu2 %306 }
 0x264   : > { %618 = vmatmul.msk.f32.vlgmr.msra.gmra.mxu1 %vm236_vm1, %v307_v34 }
 0x2e1   : > { %v327_v36 = vpop.f32.mrf.mxu1 }
 0x2e2   : > { %v330_v37 = vadd.f32 %v327_v36, %v304_v35 }
 0x2e4   : > { %667 = vtanh.f32 %v330_v37  ;;  %v619_v39 = vmul.f32 -1.442695, %v330_v37 }
 0x2e6   : > { %669 = vpow2.f32 %v619_v39 }
 0x2ea   : > { %v668_v38 = vpop.eup %667 }
 0x2eb   : > { %353 = vrot.lane.b32.xlu2 %v668_v38, %s717_s6 }
 0x2ec   : > { %v670_v40 = vpop.eup %669 }
 0x2ed   : > { %v334_v41 = vadd.f32 1.0, %v670_v40 }
 0x2ef   : > { %671 = vrcp.f32 %v334_v41  ;;  %v346_v47 = vand.u32 2147483648, %v334_v41  ;;  %vm340_vm7 = vweird.f32 %v334_v41  ;;  %v344_v48 = vand.u32 2147483647, %v334_v41 }
 0x2f1   : > { %v347_v50 = vor.u32 1.1754944e-38, %v346_v47  ;;  %vm345_vm9 = vcmp.eq.f32.partialorder %v344_v48, 8.507059e+37 }
 0x2f5   : > { %v672_v42 = vpop.eup %671 }
 0x2f6   : > { %v336_v43 = vmul.f32 %v672_v42, %v334_v41  ;;  %vm341_vm6 = vweird.f32 %v672_v42 }
 0x2f7   : > { %vm342_vm8 = vmor %vm340_vm7, %vm341_vm6 }
 0x2f8   : > { %v337_v44 = vsub.f32 1.0, %v336_v43 }
 0x2fa   : > { %v338_v45 = vmul.f32 %v672_v42, %v337_v44 }
 0x2fc   : > { %v339_v46 = vadd.f32 %v672_v42, %v338_v45 }
 0x2fe   : > { %v343_v49 = vsel %vm342_vm8, %v672_v42, %v339_v46 }
 0x2ff   : > { %v348_v52 = vsel %vm345_vm9, %v347_v50, %v343_v49 }
 0x300   : > { %v351_v54 = vmul.f32 %v348_v52, %v295_v30 }
 0x345   : > { %v354_v51 = vpop.permute.xlu2 %353 }
 0x346   : > { %v356_v53 = vmul.f32 %v354_v51, %v348_v52 }
 0x348   : > { %358 = vrot.lane.b32.xlu0 %v356_v53, %s718_s7 }
 0x3ba   : > { %v359_v55 = vpop.permute.xlu0 %358 }
 0x3bb   : > { %v361_v56 = vadd.f32 %v359_v55, %v351_v54 }
 0x3bd   : > { %673 = vtanh.f32 %v361_v56 }
 0x3c3   : > { %v674_v57 = vpop.eup %673 }
 0x3c4   : > { %364 = vrot.lane.b32.xlu1 %v674_v57, %s717_s6 }
 0x436   : > { %v365_v58 = vpop.permute.xlu1 %364 }
 0x437   : > { %v367_v59 = vmul.f32 %v365_v58, %v348_v52 }
 0x439   : > { %372 = vrot.lane.b32.xlu2 %v367_v59, %s718_s7 }
 0x493   : > { %v373_v60 = vpop.permute.xlu2 %372 }
 0x494   : > { %621 = vmatmul.msk.f32.vlgmr.msra.gmra.mxu2 %vm236_vm1, %v373_v60 }
 0x517   : > { %v393_v63 = vpop.f32.mrf.mxu2 }
 0x518   : > { %v396_v0 = vadd.f32 %v393_v63, %v370_v62 }
 0x51a   : > { %675 = vtanh.f32 %v396_v0  ;;  %v622_v2 = vmul.f32 -1.442695, %v396_v0 }
 0x51c   : > { %677 = vpow2.f32 %v622_v2 }
 0x520   : > { %v676_v1 = vpop.eup %675 }
 0x521   : > { %419 = vrot.lane.b32.xlu0 %v676_v1, %s717_s6 }
 0x522   : > { %v678_v3 = vpop.eup %677 }
 0x523   : > { %v400_v4 = vadd.f32 1.0, %v678_v3 }
 0x525   : > { %679 = vrcp.f32 %v400_v4  ;;  %v412_v10 = vand.u32 2147483648, %v400_v4  ;;  %vm406_vm11 = vweird.f32 %v400_v4  ;;  %v410_v11 = vand.u32 2147483647, %v400_v4 }
 0x527   : > { %v413_v13 = vor.u32 1.1754944e-38, %v412_v10  ;;  %vm411_vm13 = vcmp.eq.f32.partialorder %v410_v11, 8.507059e+37 }
 0x52b   : > { %v680_v5 = vpop.eup %679 }
 0x52c   : > { %v402_v6 = vmul.f32 %v680_v5, %v400_v4  ;;  %vm407_vm10 = vweird.f32 %v680_v5 }
 0x52d   : > { %vm408_vm12 = vmor %vm406_vm11, %vm407_vm10 }
 0x52e   : > { %v403_v7 = vsub.f32 1.0, %v402_v6 }
 0x530   : > { %v404_v8 = vmul.f32 %v680_v5, %v403_v7 }
 0x532   : > { %v405_v9 = vadd.f32 %v680_v5, %v404_v8 }
 0x534   : > { %v409_v12 = vsel %vm408_vm12, %v680_v5, %v405_v9 }
 0x535   : > { %v414_v15 = vsel %vm411_vm13, %v413_v13, %v409_v12 }
 0x536   : > { %v417_v17 = vmul.f32 %v414_v15, %v361_v56 }
 0x593   : > { %v420_v14 = vpop.permute.xlu0 %419 }
 0x594   : > { %v422_v16 = vmul.f32 %v420_v14, %v414_v15 }
 0x596   : > { %424 = vrot.lane.b32.xlu1 %v422_v16, %s718_s7 }
 0x608   : > { %v425_v18 = vpop.permute.xlu1 %424 }
 0x609   : > { %v427_v19 = vadd.f32 %v425_v18, %v417_v17 }
 0x60b   : > { %681 = vtanh.f32 %v427_v19 }
 0x611   : > { %v682_v20 = vpop.eup %681 }
 0x612   : > { %430 = vrot.lane.b32.xlu2 %v682_v20, %s717_s6 }
 0x66c   : > { %v431_v21 = vpop.permute.xlu2 %430 }
 0x66d   : > { %v433_v22 = vmul.f32 %v431_v21, %v414_v15 }
 0x66f   : > { %438 = vrot.lane.b32.xlu0 %v433_v22, %s718_s7 }
 0x6e1   : > { %v439_v23 = vpop.permute.xlu0 %438 }
 0x6e2   : > { %624 = vmatmul.msk.f32.vlgmr.msra.gmra.mxu3 %vm236_vm1, %v439_v23 }
 0x765   : > { %v459_v25 = vpop.f32.mrf.mxu3 }
 0x766   : > { %v462_v26 = vadd.f32 %v459_v25, %v436_v24 }
 0x768   : > { %683 = vtanh.f32 %v462_v26  ;;  %v625_v28 = vmul.f32 -1.442695, %v462_v26 }
 0x76a   : > { %685 = vpow2.f32 %v625_v28 }
 0x76e   : > { %v684_v27 = vpop.eup %683 }
 0x76f   : > { %485 = vrot.lane.b32.xlu1 %v684_v27, %s717_s6 }
 0x770   : > { %v686_v29 = vpop.eup %685 }
 0x771   : > { %v466_v30 = vadd.f32 1.0, %v686_v29 }
 0x773   : > { %687 = vrcp.f32 %v466_v30  ;;  %v478_v36 = vand.u32 2147483648, %v466_v30  ;;  %vm472_vm15 = vweird.f32 %v466_v30  ;;  %v476_v37 = vand.u32 2147483647, %v466_v30 }
 0x775   : > { %v479_v39 = vor.u32 1.1754944e-38, %v478_v36  ;;  %vm477_vm2 = vcmp.eq.f32.partialorder %v476_v37, 8.507059e+37 }
 0x779   : > { %v688_v31 = vpop.eup %687 }
 0x77a   : > { %v468_v32 = vmul.f32 %v688_v31, %v466_v30  ;;  %vm473_vm14 = vweird.f32 %v688_v31 }
 0x77b   : > { %vm474_vm0 = vmor %vm472_vm15, %vm473_vm14 }
 0x77c   : > { %v469_v33 = vsub.f32 1.0, %v468_v32 }
 0x77e   : > { %v470_v34 = vmul.f32 %v688_v31, %v469_v33 }
 0x780   : > { %v471_v35 = vadd.f32 %v688_v31, %v470_v34 }
 0x782   : > { %v475_v38 = vsel %vm474_vm0, %v688_v31, %v471_v35 }
 0x783   : > { %v480_v41 = vsel %vm477_vm2, %v479_v39, %v475_v38 }
 0x784   : > { %v483_v43 = vmul.f32 %v480_v41, %v427_v19 }
 0x7e1   : > { %v486_v40 = vpop.permute.xlu1 %485 }
 0x7e2   : > { %v488_v42 = vmul.f32 %v486_v40, %v480_v41 }
 0x7e4   : > { %490 = vrot.lane.b32.xlu2 %v488_v42, %s718_s7 }
 0x83e   : > { %v491_v44 = vpop.permute.xlu2 %490 }
 0x83f   : > { %v493_v45 = vadd.f32 %v491_v44, %v483_v43 }
 0x841   : > { %689 = vtanh.f32 %v493_v45  ;;  %506 = vrot.lane.b32.xlu2 %v493_v45, %s719_s8 }
 0x847   : > { %v690_v46 = vpop.eup %689 }
 0x848   : > { %496 = vrot.lane.b32.xlu0 %v690_v46, %s717_s6 }
 0x89b   : > { %v507_v47 = vpop.permute.xlu2 %506 }
 0x89c   : > { %509 = vst.msk [vmem:[#allocation3] sm:$0xff] %vm236_vm1, %v507_v47 }
 0x8ba   : > { %v497_v48 = vpop.permute.xlu0 %496 }
 0x8bb   : > { %v499_v49 = vmul.f32 %v497_v48, %v480_v41 }
 0x8bd   : > { %501 = vrot.lane.b32.xlu1 %v499_v49, %s718_s7 }
 0x92c   : > { %513 = sbr.rel (%p626_p6) target bundleno = 2490 (0x9ba), region = 44 }
 0x92f   : > { %v502_v50 = vpop.permute.xlu1 %501 }
 0x930   : > { %504 = vst.msk [vmem:[#allocation2] sm:$0xff] %vm236_vm1, %v502_v50 }
 0x931   : > { %v517_v51 = vld [vmem:[%s840_s2 + $0x18] sm:$0xff]  ;;  %v516_v52 = vld [vmem:[%s840_s2 + $0x10] sm:$0xff]  ;;  %v515_v53 = vld [vmem:[%s840_s2 + $0x8] sm:$0xff]  ;;  %vm544_vm3 = vcmask 23552  }
 0x932   : > { %536 = vmatpush.msra.mxu0 %v517_v51  ;;  %v514_v54 = vld [vmem:[%s840_s2] sm:$0xff] }
 0x933   : > { %v691_v55 = vld [vmem:[%s841_s3] ss:$0 sm:$0xff] }
 0x934   : > { %537 = vmatpush.msra.mxu0 %v516_v52 }
 0x936   : > { %538 = vmatpush.msra.mxu0 %v515_v53 }
 0x938   : > { %539 = vmatpush.msra.mxu0 %v514_v54 }
 0x939   : > { %627 = vmatmul.msk.f32.vlgmr.msra.gmra.mxu0 %vm236_vm1, %v502_v50 }
 0x9b6   : > { %v541_v56 = vpop.f32.mrf.mxu0 }
 0x9b7   : > { %v542_v57 = vadd.f32 %v691_v55, %v541_v56 }
 0x9b9   : > { %545 = vst.msk [vmem:[%s842_s4] sm:$0xff] %vm544_vm3, %v542_v57 }
 0x9ba PF: > { %s14_s17 = sadd.s32 1, %s714_s17   ;;  %s843_s15 = smov %s710_s16 }
 0x9bb   : > { %p11_p7 = scmp.ge.s32.totalorder %s14_s17, 5   ;;  %s844_s16 = smov %s846_s18 }
 0x9bd   :  { %13 = sbr.rel (!%p11_p7) target bundleno = 2 (0x2), region = 77 }

// kernel: ds_hybrid_forward.2
= control target key start
LH: loop header
LB: loop body
LE: loop exit
PB: predicated region body
PF: predicated region fallthrough
CT: control target
= control target key end

     0   :  { %s675_s24 = smov 0   ;;  %s722_s0 = inlined_call_operand.vmem [shape: bf16[96,20], index: 0, kind: input, shape index: {}]   ;;  %s723_s1 = inlined_call_operand.vmem [shape: bf16[96,20], index: 1, kind: input, shape index: {}]   ;;  %s724_s2 = inlined_call_operand.vmem [shape: bf16[20,8], index: 2, kind: input, shape index: {}]   ;;  %s725_s3 = inlined_call_operand.vmem [shape: f32[1,8], index: 3, kind: input, shape index: {}]   ;;  %s726_s4 = inlined_call_operand.vmem [shape: bf16[8,128], index: 4, kind: input, shape index: {}]   ;;  %s727_s5 = inlined_call_operand.vmem [shape: bf16[8,128], index: 5, kind: input, shape index: {}]   ;;  %s728_s6 = inlined_call_operand.vmem [shape: f32[1,128], index: 6, kind: input, shape index: {}]   ;;  %s729_s7 = inlined_call_operand.vmem [shape: bf16[96,128], index: 7, kind: output, shape index: {}]  }
   0x1 LB: > { %s560_s25 = sadd.s32 4294967295, %s633_s24   ;;  %p564_p0 = scmp.ge.s32.totalorder %s633_s24, 1  ;;  %s633_s24 = sphi %s675_s24, %s17_s24  }
   0x2   : > { %p249_p1 = scmp.lt.s32.totalorder %s633_s24, 4 }
   0x4   : > { %p250_p2 = pnand %p564_p0, %p249_p1 }
   0x5   : > { %s565_s28 = sshll.u32 (!%p250_p2), %s560_s25, 2 }
   0x6   : > { %253 = sbr.rel (%p250_p2) target bundleno = 327 (0x147), region = 48  ;;  %p287_p3 = scmp.lt.s32.totalorder (!%p250_p2), %s565_s28, 11 }
   0xb   : > { %v311_v0 = vld [vmem:[%s724_s2 + $0x8] sm:$0x3]  ;;  %vm342_vm0 = vcmask 1041408   ;;  %s731_s28 = smov (!%p287_p3, %s565_s28), 11  ;;  %v603_v4 = vld [vmem:[%s724_s2] sm:$0xff]  ;;  %vm335_vm1 = vcmask 162816  }
   0xc   : > { %v331_v1 = vunpack.c.l.b16 %v311_v0  ;;  %s686_s29 = sshll.u32 %s731_s28, 2  ;;  %v417_v9 = vld [vmem:[%s727_s5] sm:$0xf]  ;;  %vm425_vm2 = vcmask 1043456   ;;  %vm418_vm3 = vcmask 64512  }
   0xd   : > { %s290_s11 = scalar_lea.vmem %s722_s0, %s686_s29  ;;  %s296_s14 = scalar_lea.vmem %s723_s1, %s686_s29  ;;  %v414_v10 = vld [vmem:[%s726_s4] sm:$0xf]  ;;  %v427_v11 = vsel %vm425_vm2, %v417_v9, 0 }
   0xe   : > { %v333_v2 = vpack.c.b16 %v331_v1, %v331_v1  ;;  %v601_v5 = vld [vmem:[%s290_s11] sm:$0xff]  ;;  %v602_v7 = vld [vmem:[%s290_s11 + $0x8] sm:$0xff]  ;;  %v455_v12 = vsel %vm425_vm2, %v414_v10, 0  ;;  %436 = vmatpush.bf16.msra.mxu2 %v427_v11  ;;  %s302_s26 = scalar_lea.vmem %s729_s7, %s686_s29 }
   0xf   : > { %v604_v6 = vld [vmem:[%s296_s14] sm:$0xff]  ;;  %v605_v8 = vld [vmem:[%s296_s14 + $0x8] sm:$0xff]  ;;  %464 = vmatpush.bf16.msra.mxu3 %v455_v12 }
  0x10   : > { %v344_v3 = vsel %vm342_vm0, %v333_v2, 0  ;;  %v625_v15 = vld [vmem:[%s725_s3] ss:$0 sm:$0xff] }
  0x11   : > { %352 = vmatpush.bf16.msra.mxu0 %v344_v3  ;;  %395 = vmatpush.bf16.msra.mxu1 %v344_v3  ;;  %v626_v45 = vld [vmem:[%s728_s6] ss:$0 sm:$0xff] }
  0x15   : > { %353 = vmatpush.bf16.msra.mxu0 %v603_v4  ;;  %396 = vmatpush.bf16.msra.mxu1 %v603_v4 }
  0x18   : > { %583 = vmatmul.msk.bf16.vlgmr.msra.gmra.mxu0 %vm335_vm1, %v601_v5  ;;  %593 = vmatmul.msk.bf16.vlgmr.msra.gmra.mxu1 %vm335_vm1, %v604_v6 }
  0x28   : > { %584 = vmatmul.msk.bf16.gmra.mxu0 %vm335_vm1, %v602_v7  ;;  %594 = vmatmul.msk.bf16.gmra.mxu1 %vm335_vm1, %v605_v8 }
  0x95   : > { %v355_v13 = vpop.f32.mrf.mxu0  ;;  %v398_v14 = vpop.f32.mrf.mxu1 }
  0x96   : > { %v356_v16 = vadd.f32 %v625_v15, %v355_v13  ;;  %v399_v17 = vadd.f32 %v625_v15, %v398_v14 }
  0x98   : > { %v365_v22 = vmax.f32 %v356_v16, 0.0  ;;  %v408_v23 = vmax.f32 %v399_v17, 0.0 }
  0x9d   : > { %v357_v18 = vpop.f32.mrf.mxu0  ;;  %v400_v19 = vpop.f32.mrf.mxu1 }
  0x9e   : > { %v358_v20 = vadd.f32 %v625_v15, %v357_v18  ;;  %v401_v21 = vadd.f32 %v625_v15, %v400_v19 }
  0xa0   : > { %v366_v24 = vmax.f32 %v358_v20, 0.0  ;;  %v409_v25 = vmax.f32 %v401_v21, 0.0 }
  0xa2   : > { %v412_v26 = vpack.c.bf16 %v366_v24, %v365_v22  ;;  %v415_v27 = vpack.c.bf16 %v409_v25, %v408_v23 }
  0xa4   : > { %595 = vmatmul.msk.bf16.vlgmr.msra.gmra.mxu2 %vm418_vm3, %v415_v27  ;;  %597 = vmatmul.msk.bf16.vlgmr.msra.gmra.mxu3 %vm418_vm3, %v412_v26 }
  0xa5   : > { %v360_v28 = vpop.f32.mrf.mxu0  ;;  %v403_v29 = vpop.f32.mrf.mxu1 }
  0xa6   : > { %v361_v30 = vadd.f32 %v625_v15, %v360_v28  ;;  %v404_v31 = vadd.f32 %v625_v15, %v403_v29 }
  0xa8   : > { %v367_v36 = vmax.f32 %v361_v30, 0.0  ;;  %v410_v37 = vmax.f32 %v404_v31, 0.0 }
  0xad   : > { %v362_v32 = vpop.f32.mrf.mxu0  ;;  %v405_v33 = vpop.f32.mrf.mxu1 }
  0xae   : > { %v363_v34 = vadd.f32 %v625_v15, %v362_v32  ;;  %v406_v35 = vadd.f32 %v625_v15, %v405_v33 }
  0xb0   : > { %v368_v38 = vmax.f32 %v363_v34, 0.0  ;;  %v411_v39 = vmax.f32 %v406_v35, 0.0 }
  0xb2   : > { %v413_v40 = vpack.c.bf16 %v368_v38, %v367_v36  ;;  %v416_v41 = vpack.c.bf16 %v411_v39, %v410_v37 }
  0xb4   : > { %596 = vmatmul.msk.bf16.gmra.mxu2 %vm418_vm3, %v416_v41  ;;  %598 = vmatmul.msk.bf16.gmra.mxu3 %vm418_vm3, %v413_v40 }
 0x127   : > { %v438_v42 = vpop.f32.mrf.mxu2  ;;  %v466_v43 = vpop.f32.mrf.mxu3 }
 0x128   : > { %v467_v44 = vadd.f32 %v466_v43, %v438_v42 }
 0x12a   : > { %v480_v49 = vadd.f32 %v626_v45, %v467_v44 }
 0x12f   : > { %v440_v46 = vpop.f32.mrf.mxu2  ;;  %v468_v47 = vpop.f32.mrf.mxu3 }
 0x130   : > { %v469_v48 = vadd.f32 %v468_v47, %v440_v46 }
 0x132   : > { %v481_v50 = vadd.f32 %v626_v45, %v469_v48 }
 0x134   : > { %v609_v51 = vpack.c.bf16 %v481_v50, %v480_v49 }
 0x136   : > { %610 = vst [vmem:[%s302_s26] sm:$0xff] %v609_v51  }
 0x137   : > { %v443_v52 = vpop.f32.mrf.mxu2  ;;  %v471_v53 = vpop.f32.mrf.mxu3 }
 0x138   : > { %v472_v54 = vadd.f32 %v471_v53, %v443_v52 }
 0x13a   : > { %v482_v58 = vadd.f32 %v626_v45, %v472_v54 }
 0x13f   : > { %v445_v55 = vpop.f32.mrf.mxu2  ;;  %v473_v56 = vpop.f32.mrf.mxu3 }
 0x140   : > { %v474_v57 = vadd.f32 %v473_v56, %v445_v55 }
 0x142   : > { %v483_v59 = vadd.f32 %v626_v45, %v474_v57 }
 0x144   : > { %v614_v60 = vpack.c.bf16 %v483_v59, %v482_v58 }
 0x146   : > { %616 = vst [vmem:[%s302_s26 + $0x8] sm:$0xff] %v614_v60  }
 0x147 PF: > { %s17_s24 = sadd.s32 1, %s633_s24  }
 0x148   : > { %p14_p4 = scmp.ge.s32.totalorder %s17_s24, 5  }
 0x14a   :  { %16 = sbr.rel (!%p14_p4) target bundleno = 1 (0x1), region = 81 }

</bundles_post_ra>
